<compile_context>
chip_gen: v6e
topology: v6e:2x2x1
jax: 0.10.0
libtpu: 0.0.40
codegen_flags: <defaults>
</compile_context>

<pallas_src>
import itertools
import math

import jax
import jax.numpy as jnp
from jax.experimental import pallas as pl
from jax.experimental.pallas import tpu as pltpu


def _round_up(x: int, m: int) -> int:
    return ((x + m - 1) // m) * m


def _ceil_div(a: int, b: int) -> int:
    return -(-a // b)


def _sublane_pack(dtype) -> int:
    # Rows per packed 32-bit sublane group: f32 -> 8, bf16 -> 16, int8/fp8 -> 32.
    return max(8, 32 // jnp.dtype(dtype).itemsize)


def view_flatten(x):
    """Forward of the PyTorch `View` module: X.view(X.shape[0], -1).

    PyTorch .view() is metadata-only, so the optimal translation is a bare
    reshape — no pallas_call on this (default) path.
    """
    return jnp.reshape(x, (x.shape[0], -1))


def _flatten_block_kernel(x_ref, o_ref):
    """Copy one N-D input block into its flattened 2-D output block.

    x_ref: (row_tile, d1_tile, m2, ..., last)   (trailing dims are full extents)
    o_ref: (row_tile, d1_tile * m2 * ... * last)

    The flatten is a sequence of static contiguous slice stores (always
    lowerable).  The narrow in-VMEM stores hide under the HBM-bound block DMAs;
    the HBM write of the output block itself is one lane-dense DMA.
    """
    # TODO(synk): replace the store loop with a single x_ref[...].reshape(rows, -1)
    # once Mosaic's minor-dim-merging relayout is confirmed on the target jaxlib.
    shape = x_ref.shape
    lead = shape[1:-1]
    if not lead:  # input block already 2-D: plain tile copy
        o_ref[...] = x_ref[...]
        return
    last = shape[-1]
    for flat_idx, idxs in enumerate(itertools.product(*(range(d) for d in lead))):
        o_ref[:, flat_idx * last:(flat_idx + 1) * last] = (
            x_ref[(slice(None),) + idxs + (slice(None),)]
        )


def _pick_row_tile(b: int, pack: int) -> int:
    # Output block's sublane dim must be a multiple of the sublane pack or the
    # full batch extent.  Cap at 64 rows; a ragged final block is masked.
    if b <= pack:
        return b
    return min(_round_up(b, pack), max(64, pack))


def view_flatten_copy(x, *, max_tile_bytes=2 * 1024 * 1024, unroll_cap=256):
    """Explicitly materialized `X.view(B, -1)` as a single-pass Pallas copy.

    Reads `x` in its native layout and writes the flattened (B, F) buffer —
    one HBM read + one HBM write (the roofline for a materializing flatten).
    The 2 MiB default tile keeps the double-buffered footprint inside every
    generation's default scoped VMEM.
    """
    b = x.shape[0]
    feat = int(math.prod(x.shape[1:])) if x.ndim > 1 else 1
    if x.ndim < 2:
        x = jnp.reshape(x, (b, 1))

    d1 = x.shape[1]
    trailing = tuple(x.shape[2:])          # dims kept at full extent per block
    per_d1 = int(math.prod(trailing)) if trailing else 1
    mid_prod = int(math.prod(trailing[:-1])) if len(trailing) > 1 else 1

    itemsize = jnp.dtype(x.dtype).itemsize
    pack = _sublane_pack(x.dtype)
    row_tile = _pick_row_tile(b, pack)
    row_pad = _round_up(row_tile, pack)

    # Output block width d1_tile*per_d1 must be a multiple of 128 (or the full
    # feature extent) -> d1_tile must be a multiple of lane_step.
    lane_step = 128 // math.gcd(per_d1, 128)
    if len(trailing) == 1:
        # rank-3 input: d1 is the block's second-minor dim -> sublane constraint.
        lane_step = math.lcm(lane_step, pack)

    # Padded VMEM bytes of the input block per unit of d1 (lane dim pads to 128,
    # block second-minor pads to the sublane pack).
    if trailing:
        padded = list(trailing)
        padded[-1] = _round_up(padded[-1], 128)
        if len(padded) >= 2:
            padded[-2] = _round_up(padded[-2], pack)
        per_d1_vmem = int(math.prod(padded))
    else:
        per_d1_vmem = 1
    bytes_per_d1 = row_pad * per_d1_vmem * itemsize

    max_by_bytes = max(1, max_tile_bytes // bytes_per_d1)
    max_by_unroll = max(1, unroll_cap // max(mid_prod, 1)) if trailing else d1
    cap = min(max_by_bytes, max_by_unroll)
    if cap >= d1:
        d1_tile = d1                               # whole feature extent per block
    else:
        d1_tile = max(lane_step, (cap // lane_step) * lane_step)

    grid_rows = _ceil_div(b, row_tile)
    grid_d1 = _ceil_div(d1, d1_tile)

    # v7x has 2 TensorCores: ensure a "parallel" axis has >= 2 steps when the
    # feature axis can legally be split (also enables DMA/compute pipelining).
    if grid_rows * grid_d1 == 1 and d1 > lane_step:
        half = _round_up(_ceil_div(d1, 2), lane_step)
        if half < d1:
            d1_tile = half
        elif lane_step < d1:
            d1_tile = lane_step
        grid_d1 = _ceil_div(d1, d1_tile)

    f_tile = d1_tile * per_d1
    ntrail = len(trailing)

    in_spec = pl.BlockSpec(
        (row_tile, d1_tile) + trailing,
        lambda i, j: (i, j) + (0,) * ntrail,
    )
    out_spec = pl.BlockSpec((row_tile, f_tile), lambda i, j: (i, j))

    # Double-buffered footprint; only raise the scoped-VMEM limit when needed.
    in_block_bytes = d1_tile * bytes_per_d1
    out_block_bytes = row_pad * _round_up(f_tile, 128) * itemsize
    needed = 2 * (in_block_bytes + out_block_bytes)
    params = dict(dimension_semantics=("parallel", "parallel"))
    if needed > 12 * 1024 * 1024:
        params["vmem_limit_bytes"] = int(
            min(needed + 4 * 1024 * 1024, 64 * 1024 * 1024)
        )

    return pl.pallas_call(
        _flatten_block_kernel,
        out_shape=jax.ShapeDtypeStruct((b, feat), x.dtype),
        grid=(grid_rows, grid_d1),
        in_specs=[in_spec],
        out_specs=out_spec,
        compiler_params=pltpu.CompilerParams(**params),
    )(x)


if __name__ == "__main__":
    key = jax.random.PRNGKey(0)
    # Small NCHW input consistent with the module's forward: batch=2, C=4, H=W=16.
    x = jax.random.normal(key, (2, 4, 16, 16), dtype=jnp.float32)
    ref = jnp.reshape(x, (2, -1))

    # Default forward path (matches PyTorch View semantics: no copy, no kernel).
    y_view = jax.block_until_ready(view_flatten(x))

    # Explicitly materialized (B, F) buffer via the Pallas kernel.
    y_kernel = jax.block_until_ready(view_flatten_copy(x))

    assert y_view.shape == (2, 4 * 16 * 16), y_view.shape
    assert y_kernel.shape == (2, 4 * 16 * 16), y_kernel.shape
    assert y_kernel.dtype == x.dtype
    assert bool(jnp.array_equal(y_view, ref))
    assert bool(jnp.array_equal(y_kernel, ref))
    print("KERNEL_OK")
</pallas_src>

<mosaic_0001>
module attributes {stable_mosaic.version = 11 : i64} {
  func.func @_flatten_block_kernel(%arg0: i32, %arg1: i32, %arg2: memref<2x2x16x16xf32, #tpu.memory_space<vmem>>, %arg3: memref<2x512xf32, #tpu.memory_space<vmem>>) attributes {dimension_semantics = [#tpu.dimension_semantics<parallel>, #tpu.dimension_semantics<parallel>], iteration_bounds = array<i64: 1, 2>, scalar_prefetch = 0 : i64, scratch_operands = 0 : i64, tpu.core_type = #tpu.core_type<tc>, window_params = [{transform_indices = @transform_0, window_bounds = array<i64: 2, 2, 16, 16>}, {transform_indices = @transform_1, window_bounds = array<i64: 2, 512>}]} {
    %c0 = arith.constant 0 : index
    %c0_0 = arith.constant 0 : index
    %c0_1 = arith.constant 0 : index
    %c0_2 = arith.constant 0 : index
    %0 = vector.load %arg2[%c0, %c0_0, %c0_1, %c0_2] : memref<2x2x16x16xf32, #tpu.memory_space<vmem>>, vector<2x1x1x16xf32>
    %1 = vector.shape_cast %0 : vector<2x1x1x16xf32> to vector<2x16xf32>
    %c0_3 = arith.constant 0 : index
    %c0_4 = arith.constant 0 : index
    %2 = vector.load %arg3[%c0_3, %c0_4] : memref<2x512xf32, #tpu.memory_space<vmem>>, vector<2x16xf32>
    tpu.vector_store %arg3[%c0_3, %c0_4], %1 {strides = array<i32>} : memref<2x512xf32, #tpu.memory_space<vmem>>, vector<2x16xf32>,
    %c0_5 = arith.constant 0 : index
    %c0_6 = arith.constant 0 : index
    %c1 = arith.constant 1 : index
    %c0_7 = arith.constant 0 : index
    %3 = vector.load %arg2[%c0_5, %c0_6, %c1, %c0_7] : memref<2x2x16x16xf32, #tpu.memory_space<vmem>>, vector<2x1x1x16xf32>
    %4 = vector.shape_cast %3 : vector<2x1x1x16xf32> to vector<2x16xf32>
    %c0_8 = arith.constant 0 : index
    %c16 = arith.constant 16 : index
    %5 = vector.load %arg3[%c0_8, %c16] : memref<2x512xf32, #tpu.memory_space<vmem>>, vector<2x16xf32>
    tpu.vector_store %arg3[%c0_8, %c16], %4 {strides = array<i32>} : memref<2x512xf32, #tpu.memory_space<vmem>>, vector<2x16xf32>,
    %c0_9 = arith.constant 0 : index
    %c0_10 = arith.constant 0 : index
    %c2 = arith.constant 2 : index
    %c0_11 = arith.constant 0 : index
    %6 = vector.load %arg2[%c0_9, %c0_10, %c2, %c0_11] : memref<2x2x16x16xf32, #tpu.memory_space<vmem>>, vector<2x1x1x16xf32>
    %7 = vector.shape_cast %6 : vector<2x1x1x16xf32> to vector<2x16xf32>
    %c0_12 = arith.constant 0 : index
    %c32 = arith.constant 32 : index
    %8 = vector.load %arg3[%c0_12, %c32] : memref<2x512xf32, #tpu.memory_space<vmem>>, vector<2x16xf32>
    tpu.vector_store %arg3[%c0_12, %c32], %7 {strides = array<i32>} : memref<2x512xf32, #tpu.memory_space<vmem>>, vector<2x16xf32>,
    %c0_13 = arith.constant 0 : index
    %c0_14 = arith.constant 0 : index
    %c3 = arith.constant 3 : index
    %c0_15 = arith.constant 0 : index
    %9 = vector.load %arg2[%c0_13, %c0_14, %c3, %c0_15] : memref<2x2x16x16xf32, #tpu.memory_space<vmem>>, vector<2x1x1x16xf32>
    %10 = vector.shape_cast %9 : vector<2x1x1x16xf32> to vector<2x16xf32>
    %c0_16 = arith.constant 0 : index
    %c48 = arith.constant 48 : index
    %11 = vector.load %arg3[%c0_16, %c48] : memref<2x512xf32, #tpu.memory_space<vmem>>, vector<2x16xf32>
    tpu.vector_store %arg3[%c0_16, %c48], %10 {strides = array<i32>} : memref<2x512xf32, #tpu.memory_space<vmem>>, vector<2x16xf32>,
    %c0_17 = arith.constant 0 : index
    %c0_18 = arith.constant 0 : index
    %c4 = arith.constant 4 : index
    %c0_19 = arith.constant 0 : index
    %12 = vector.load %arg2[%c0_17, %c0_18, %c4, %c0_19] : memref<2x2x16x16xf32, #tpu.memory_space<vmem>>, vector<2x1x1x16xf32>
    %13 = vector.shape_cast %12 : vector<2x1x1x16xf32> to vector<2x16xf32>
    %c0_20 = arith.constant 0 : index
    %c64 = arith.constant 64 : index
    %14 = vector.load %arg3[%c0_20, %c64] : memref<2x512xf32, #tpu.memory_space<vmem>>, vector<2x16xf32>
    tpu.vector_store %arg3[%c0_20, %c64], %13 {strides = array<i32>} : memref<2x512xf32, #tpu.memory_space<vmem>>, vector<2x16xf32>,
    %c0_21 = arith.constant 0 : index
    %c0_22 = arith.constant 0 : index
    %c5 = arith.constant 5 : index
    %c0_23 = arith.constant 0 : index
    %15 = vector.load %arg2[%c0_21, %c0_22, %c5, %c0_23] : memref<2x2x16x16xf32, #tpu.memory_space<vmem>>, vector<2x1x1x16xf32>
    %16 = vector.shape_cast %15 : vector<2x1x1x16xf32> to vector<2x16xf32>
    %c0_24 = arith.constant 0 : index
    %c80 = arith.constant 80 : index
    %17 = vector.load %arg3[%c0_24, %c80] : memref<2x512xf32, #tpu.memory_space<vmem>>, vector<2x16xf32>
    tpu.vector_store %arg3[%c0_24, %c80], %16 {strides = array<i32>} : memref<2x512xf32, #tpu.memory_space<vmem>>, vector<2x16xf32>,
    %c0_25 = arith.constant 0 : index
    %c0_26 = arith.constant 0 : index
    %c6 = arith.constant 6 : index
    %c0_27 = arith.constant 0 : index
    %18 = vector.load %arg2[%c0_25, %c0_26, %c6, %c0_27] : memref<2x2x16x16xf32, #tpu.memory_space<vmem>>, vector<2x1x1x16xf32>
    %19 = vector.shape_cast %18 : vector<2x1x1x16xf32> to vector<2x16xf32>
    %c0_28 = arith.constant 0 : index
    %c96 = arith.constant 96 : index
    %20 = vector.load %arg3[%c0_28, %c96] : memref<2x512xf32, #tpu.memory_space<vmem>>, vector<2x16xf32>
    tpu.vector_store %arg3[%c0_28, %c96], %19 {strides = array<i32>} : memref<2x512xf32, #tpu.memory_space<vmem>>, vector<2x16xf32>,
    %c0_29 = arith.constant 0 : index
    %c0_30 = arith.constant 0 : index
    %c7 = arith.constant 7 : index
    %c0_31 = arith.constant 0 : index
    %21 = vector.load %arg2[%c0_29, %c0_30, %c7, %c0_31] : memref<2x2x16x16xf32, #tpu.memory_space<vmem>>, vector<2x1x1x16xf32>
    %22 = vector.shape_cast %21 : vector<2x1x1x16xf32> to vector<2x16xf32>
    %c0_32 = arith.constant 0 : index
    %c112 = arith.constant 112 : index
    %23 = vector.load %arg3[%c0_32, %c112] : memref<2x512xf32, #tpu.memory_space<vmem>>, vector<2x16xf32>
    tpu.vector_store %arg3[%c0_32, %c112], %22 {strides = array<i32>} : memref<2x512xf32, #tpu.memory_space<vmem>>, vector<2x16xf32>,
    %c0_33 = arith.constant 0 : index
    %c0_34 = arith.constant 0 : index
    %c8 = arith.constant 8 : index
    %c0_35 = arith.constant 0 : index
    %24 = vector.load %arg2[%c0_33, %c0_34, %c8, %c0_35] : memref<2x2x16x16xf32, #tpu.memory_space<vmem>>, vector<2x1x1x16xf32>
    %25 = vector.shape_cast %24 : vector<2x1x1x16xf32> to vector<2x16xf32>
    %c0_36 = arith.constant 0 : index
    %c128 = arith.constant 128 : index
    %26 = vector.load %arg3[%c0_36, %c128] : memref<2x512xf32, #tpu.memory_space<vmem>>, vector<2x16xf32>
    tpu.vector_store %arg3[%c0_36, %c128], %25 {strides = array<i32>} : memref<2x512xf32, #tpu.memory_space<vmem>>, vector<2x16xf32>,
    %c0_37 = arith.constant 0 : index
    %c0_38 = arith.constant 0 : index
    %c9 = arith.constant 9 : index
    %c0_39 = arith.constant 0 : index
    %27 = vector.load %arg2[%c0_37, %c0_38, %c9, %c0_39] : memref<2x2x16x16xf32, #tpu.memory_space<vmem>>, vector<2x1x1x16xf32>
    %28 = vector.shape_cast %27 : vector<2x1x1x16xf32> to vector<2x16xf32>
    %c0_40 = arith.constant 0 : index
    %c144 = arith.constant 144 : index
    %29 = vector.load %arg3[%c0_40, %c144] : memref<2x512xf32, #tpu.memory_space<vmem>>, vector<2x16xf32>
    tpu.vector_store %arg3[%c0_40, %c144], %28 {strides = array<i32>} : memref<2x512xf32, #tpu.memory_space<vmem>>, vector<2x16xf32>,
    %c0_41 = arith.constant 0 : index
    %c0_42 = arith.constant 0 : index
    %c10 = arith.constant 10 : index
    %c0_43 = arith.constant 0 : index
    %30 = vector.load %arg2[%c0_41, %c0_42, %c10, %c0_43] : memref<2x2x16x16xf32, #tpu.memory_space<vmem>>, vector<2x1x1x16xf32>
    %31 = vector.shape_cast %30 : vector<2x1x1x16xf32> to vector<2x16xf32>
    %c0_44 = arith.constant 0 : index
    %c160 = arith.constant 160 : index
    %32 = vector.load %arg3[%c0_44, %c160] : memref<2x512xf32, #tpu.memory_space<vmem>>, vector<2x16xf32>
    tpu.vector_store %arg3[%c0_44, %c160], %31 {strides = array<i32>} : memref<2x512xf32, #tpu.memory_space<vmem>>, vector<2x16xf32>,
    %c0_45 = arith.constant 0 : index
    %c0_46 = arith.constant 0 : index
    %c11 = arith.constant 11 : index
    %c0_47 = arith.constant 0 : index
    %33 = vector.load %arg2[%c0_45, %c0_46, %c11, %c0_47] : memref<2x2x16x16xf32, #tpu.memory_space<vmem>>, vector<2x1x1x16xf32>
    %34 = vector.shape_cast %33 : vector<2x1x1x16xf32> to vector<2x16xf32>
    %c0_48 = arith.constant 0 : index
    %c176 = arith.constant 176 : index
    %35 = vector.load %arg3[%c0_48, %c176] : memref<2x512xf32, #tpu.memory_space<vmem>>, vector<2x16xf32>
    tpu.vector_store %arg3[%c0_48, %c176], %34 {strides = array<i32>} : memref<2x512xf32, #tpu.memory_space<vmem>>, vector<2x16xf32>,
    %c0_49 = arith.constant 0 : index
    %c0_50 = arith.constant 0 : index
    %c12 = arith.constant 12 : index
    %c0_51 = arith.constant 0 : index
    %36 = vector.load %arg2[%c0_49, %c0_50, %c12, %c0_51] : memref<2x2x16x16xf32, #tpu.memory_space<vmem>>, vector<2x1x1x16xf32>
    %37 = vector.shape_cast %36 : vector<2x1x1x16xf32> to vector<2x16xf32>
    %c0_52 = arith.constant 0 : index
    %c192 = arith.constant 192 : index
    %38 = vector.load %arg3[%c0_52, %c192] : memref<2x512xf32, #tpu.memory_space<vmem>>, vector<2x16xf32>
    tpu.vector_store %arg3[%c0_52, %c192], %37 {strides = array<i32>} : memref<2x512xf32, #tpu.memory_space<vmem>>, vector<2x16xf32>,
    %c0_53 = arith.constant 0 : index
    %c0_54 = arith.constant 0 : index
    %c13 = arith.constant 13 : index
    %c0_55 = arith.constant 0 : index
    %39 = vector.load %arg2[%c0_53, %c0_54, %c13, %c0_55] : memref<2x2x16x16xf32, #tpu.memory_space<vmem>>, vector<2x1x1x16xf32>
    %40 = vector.shape_cast %39 : vector<2x1x1x16xf32> to vector<2x16xf32>
    %c0_56 = arith.constant 0 : index
    %c208 = arith.constant 208 : index
    %41 = vector.load %arg3[%c0_56, %c208] : memref<2x512xf32, #tpu.memory_space<vmem>>, vector<2x16xf32>
    tpu.vector_store %arg3[%c0_56, %c208], %40 {strides = array<i32>} : memref<2x512xf32, #tpu.memory_space<vmem>>, vector<2x16xf32>,
    %c0_57 = arith.constant 0 : index
    %c0_58 = arith.constant 0 : index
    %c14 = arith.constant 14 : index
    %c0_59 = arith.constant 0 : index
    %42 = vector.load %arg2[%c0_57, %c0_58, %c14, %c0_59] : memref<2x2x16x16xf32, #tpu.memory_space<vmem>>, vector<2x1x1x16xf32>
    %43 = vector.shape_cast %42 : vector<2x1x1x16xf32> to vector<2x16xf32>
    %c0_60 = arith.constant 0 : index
    %c224 = arith.constant 224 : index
    %44 = vector.load %arg3[%c0_60, %c224] : memref<2x512xf32, #tpu.memory_space<vmem>>, vector<2x16xf32>
    tpu.vector_store %arg3[%c0_60, %c224], %43 {strides = array<i32>} : memref<2x512xf32, #tpu.memory_space<vmem>>, vector<2x16xf32>,
    %c0_61 = arith.constant 0 : index
    %c0_62 = arith.constant 0 : index
    %c15 = arith.constant 15 : index
    %c0_63 = arith.constant 0 : index
    %45 = vector.load %arg2[%c0_61, %c0_62, %c15, %c0_63] : memref<2x2x16x16xf32, #tpu.memory_space<vmem>>, vector<2x1x1x16xf32>
    %46 = vector.shape_cast %45 : vector<2x1x1x16xf32> to vector<2x16xf32>
    %c0_64 = arith.constant 0 : index
    %c240 = arith.constant 240 : index
    %47 = vector.load %arg3[%c0_64, %c240] : memref<2x512xf32, #tpu.memory_space<vmem>>, vector<2x16xf32>
    tpu.vector_store %arg3[%c0_64, %c240], %46 {strides = array<i32>} : memref<2x512xf32, #tpu.memory_space<vmem>>, vector<2x16xf32>,
    %c0_65 = arith.constant 0 : index
    %c1_66 = arith.constant 1 : index
    %c0_67 = arith.constant 0 : index
    %c0_68 = arith.constant 0 : index
    %48 = vector.load %arg2[%c0_65, %c1_66, %c0_67, %c0_68] : memref<2x2x16x16xf32, #tpu.memory_space<vmem>>, vector<2x1x1x16xf32>
    %49 = vector.shape_cast %48 : vector<2x1x1x16xf32> to vector<2x16xf32>
    %c0_69 = arith.constant 0 : index
    %c256 = arith.constant 256 : index
    %50 = vector.load %arg3[%c0_69, %c256] : memref<2x512xf32, #tpu.memory_space<vmem>>, vector<2x16xf32>
    tpu.vector_store %arg3[%c0_69, %c256], %49 {strides = array<i32>} : memref<2x512xf32, #tpu.memory_space<vmem>>, vector<2x16xf32>,
    %c0_70 = arith.constant 0 : index
    %c1_71 = arith.constant 1 : index
    %c1_72 = arith.constant 1 : index
    %c0_73 = arith.constant 0 : index
    %51 = vector.load %arg2[%c0_70, %c1_71, %c1_72, %c0_73] : memref<2x2x16x16xf32, #tpu.memory_space<vmem>>, vector<2x1x1x16xf32>
    %52 = vector.shape_cast %51 : vector<2x1x1x16xf32> to vector<2x16xf32>
    %c0_74 = arith.constant 0 : index
    %c272 = arith.constant 272 : index
    %53 = vector.load %arg3[%c0_74, %c272] : memref<2x512xf32, #tpu.memory_space<vmem>>, vector<2x16xf32>
    tpu.vector_store %arg3[%c0_74, %c272], %52 {strides = array<i32>} : memref<2x512xf32, #tpu.memory_space<vmem>>, vector<2x16xf32>,
    %c0_75 = arith.constant 0 : index
    %c1_76 = arith.constant 1 : index
    %c2_77 = arith.constant 2 : index
    %c0_78 = arith.constant 0 : index
    %54 = vector.load %arg2[%c0_75, %c1_76, %c2_77, %c0_78] : memref<2x2x16x16xf32, #tpu.memory_space<vmem>>, vector<2x1x1x16xf32>
    %55 = vector.shape_cast %54 : vector<2x1x1x16xf32> to vector<2x16xf32>
    %c0_79 = arith.constant 0 : index
    %c288 = arith.constant 288 : index
    %56 = vector.load %arg3[%c0_79, %c288] : memref<2x512xf32, #tpu.memory_space<vmem>>, vector<2x16xf32>
    tpu.vector_store %arg3[%c0_79, %c288], %55 {strides = array<i32>} : memref<2x512xf32, #tpu.memory_space<vmem>>, vector<2x16xf32>,
    %c0_80 = arith.constant 0 : index
    %c1_81 = arith.constant 1 : index
    %c3_82 = arith.constant 3 : index
    %c0_83 = arith.constant 0 : index
    %57 = vector.load %arg2[%c0_80, %c1_81, %c3_82, %c0_83] : memref<2x2x16x16xf32, #tpu.memory_space<vmem>>, vector<2x1x1x16xf32>
    %58 = vector.shape_cast %57 : vector<2x1x1x16xf32> to vector<2x16xf32>
    %c0_84 = arith.constant 0 : index
    %c304 = arith.constant 304 : index
    %59 = vector.load %arg3[%c0_84, %c304] : memref<2x512xf32, #tpu.memory_space<vmem>>, vector<2x16xf32>
    tpu.vector_store %arg3[%c0_84, %c304], %58 {strides = array<i32>} : memref<2x512xf32, #tpu.memory_space<vmem>>, vector<2x16xf32>,
    %c0_85 = arith.constant 0 : index
    %c1_86 = arith.constant 1 : index
    %c4_87 = arith.constant 4 : index
    %c0_88 = arith.constant 0 : index
    %60 = vector.load %arg2[%c0_85, %c1_86, %c4_87, %c0_88] : memref<2x2x16x16xf32, #tpu.memory_space<vmem>>, vector<2x1x1x16xf32>
    %61 = vector.shape_cast %60 : vector<2x1x1x16xf32> to vector<2x16xf32>
    %c0_89 = arith.constant 0 : index
    %c320 = arith.constant 320 : index
    %62 = vector.load %arg3[%c0_89, %c320] : memref<2x512xf32, #tpu.memory_space<vmem>>, vector<2x16xf32>
    tpu.vector_store %arg3[%c0_89, %c320], %61 {strides = array<i32>} : memref<2x512xf32, #tpu.memory_space<vmem>>, vector<2x16xf32>,
    %c0_90 = arith.constant 0 : index
    %c1_91 = arith.constant 1 : index
    %c5_92 = arith.constant 5 : index
    %c0_93 = arith.constant 0 : index
    %63 = vector.load %arg2[%c0_90, %c1_91, %c5_92, %c0_93] : memref<2x2x16x16xf32, #tpu.memory_space<vmem>>, vector<2x1x1x16xf32>
    %64 = vector.shape_cast %63 : vector<2x1x1x16xf32> to vector<2x16xf32>
    %c0_94 = arith.constant 0 : index
    %c336 = arith.constant 336 : index
    %65 = vector.load %arg3[%c0_94, %c336] : memref<2x512xf32, #tpu.memory_space<vmem>>, vector<2x16xf32>
    tpu.vector_store %arg3[%c0_94, %c336], %64 {strides = array<i32>} : memref<2x512xf32, #tpu.memory_space<vmem>>, vector<2x16xf32>,
    %c0_95 = arith.constant 0 : index
    %c1_96 = arith.constant 1 : index
    %c6_97 = arith.constant 6 : index
    %c0_98 = arith.constant 0 : index
    %66 = vector.load %arg2[%c0_95, %c1_96, %c6_97, %c0_98] : memref<2x2x16x16xf32, #tpu.memory_space<vmem>>, vector<2x1x1x16xf32>
    %67 = vector.shape_cast %66 : vector<2x1x1x16xf32> to vector<2x16xf32>
    %c0_99 = arith.constant 0 : index
    %c352 = arith.constant 352 : index
    %68 = vector.load %arg3[%c0_99, %c352] : memref<2x512xf32, #tpu.memory_space<vmem>>, vector<2x16xf32>
    tpu.vector_store %arg3[%c0_99, %c352], %67 {strides = array<i32>} : memref<2x512xf32, #tpu.memory_space<vmem>>, vector<2x16xf32>,
    %c0_100 = arith.constant 0 : index
    %c1_101 = arith.constant 1 : index
    %c7_102 = arith.constant 7 : index
    %c0_103 = arith.constant 0 : index
    %69 = vector.load %arg2[%c0_100, %c1_101, %c7_102, %c0_103] : memref<2x2x16x16xf32, #tpu.memory_space<vmem>>, vector<2x1x1x16xf32>
    %70 = vector.shape_cast %69 : vector<2x1x1x16xf32> to vector<2x16xf32>
    %c0_104 = arith.constant 0 : index
    %c368 = arith.constant 368 : index
    %71 = vector.load %arg3[%c0_104, %c368] : memref<2x512xf32, #tpu.memory_space<vmem>>, vector<2x16xf32>
    tpu.vector_store %arg3[%c0_104, %c368], %70 {strides = array<i32>} : memref<2x512xf32, #tpu.memory_space<vmem>>, vector<2x16xf32>,
    %c0_105 = arith.constant 0 : index
    %c1_106 = arith.constant 1 : index
    %c8_107 = arith.constant 8 : index
    %c0_108 = arith.constant 0 : index
    %72 = vector.load %arg2[%c0_105, %c1_106, %c8_107, %c0_108] : memref<2x2x16x16xf32, #tpu.memory_space<vmem>>, vector<2x1x1x16xf32>
    %73 = vector.shape_cast %72 : vector<2x1x1x16xf32> to vector<2x16xf32>
    %c0_109 = arith.constant 0 : index
    %c384 = arith.constant 384 : index
    %74 = vector.load %arg3[%c0_109, %c384] : memref<2x512xf32, #tpu.memory_space<vmem>>, vector<2x16xf32>
    tpu.vector_store %arg3[%c0_109, %c384], %73 {strides = array<i32>} : memref<2x512xf32, #tpu.memory_space<vmem>>, vector<2x16xf32>,
    %c0_110 = arith.constant 0 : index
    %c1_111 = arith.constant 1 : index
    %c9_112 = arith.constant 9 : index
    %c0_113 = arith.constant 0 : index
    %75 = vector.load %arg2[%c0_110, %c1_111, %c9_112, %c0_113] : memref<2x2x16x16xf32, #tpu.memory_space<vmem>>, vector<2x1x1x16xf32>
    %76 = vector.shape_cast %75 : vector<2x1x1x16xf32> to vector<2x16xf32>
    %c0_114 = arith.constant 0 : index
    %c400 = arith.constant 400 : index
    %77 = vector.load %arg3[%c0_114, %c400] : memref<2x512xf32, #tpu.memory_space<vmem>>, vector<2x16xf32>
    tpu.vector_store %arg3[%c0_114, %c400], %76 {strides = array<i32>} : memref<2x512xf32, #tpu.memory_space<vmem>>, vector<2x16xf32>,
    %c0_115 = arith.constant 0 : index
    %c1_116 = arith.constant 1 : index
    %c10_117 = arith.constant 10 : index
    %c0_118 = arith.constant 0 : index
    %78 = vector.load %arg2[%c0_115, %c1_116, %c10_117, %c0_118] : memref<2x2x16x16xf32, #tpu.memory_space<vmem>>, vector<2x1x1x16xf32>
    %79 = vector.shape_cast %78 : vector<2x1x1x16xf32> to vector<2x16xf32>
    %c0_119 = arith.constant 0 : index
    %c416 = arith.constant 416 : index
    %80 = vector.load %arg3[%c0_119, %c416] : memref<2x512xf32, #tpu.memory_space<vmem>>, vector<2x16xf32>
    tpu.vector_store %arg3[%c0_119, %c416], %79 {strides = array<i32>} : memref<2x512xf32, #tpu.memory_space<vmem>>, vector<2x16xf32>,
    %c0_120 = arith.constant 0 : index
    %c1_121 = arith.constant 1 : index
    %c11_122 = arith.constant 11 : index
    %c0_123 = arith.constant 0 : index
    %81 = vector.load %arg2[%c0_120, %c1_121, %c11_122, %c0_123] : memref<2x2x16x16xf32, #tpu.memory_space<vmem>>, vector<2x1x1x16xf32>
    %82 = vector.shape_cast %81 : vector<2x1x1x16xf32> to vector<2x16xf32>
    %c0_124 = arith.constant 0 : index
    %c432 = arith.constant 432 : index
    %83 = vector.load %arg3[%c0_124, %c432] : memref<2x512xf32, #tpu.memory_space<vmem>>, vector<2x16xf32>
    tpu.vector_store %arg3[%c0_124, %c432], %82 {strides = array<i32>} : memref<2x512xf32, #tpu.memory_space<vmem>>, vector<2x16xf32>,
    %c0_125 = arith.constant 0 : index
    %c1_126 = arith.constant 1 : index
    %c12_127 = arith.constant 12 : index
    %c0_128 = arith.constant 0 : index
    %84 = vector.load %arg2[%c0_125, %c1_126, %c12_127, %c0_128] : memref<2x2x16x16xf32, #tpu.memory_space<vmem>>, vector<2x1x1x16xf32>
    %85 = vector.shape_cast %84 : vector<2x1x1x16xf32> to vector<2x16xf32>
    %c0_129 = arith.constant 0 : index
    %c448 = arith.constant 448 : index
    %86 = vector.load %arg3[%c0_129, %c448] : memref<2x512xf32, #tpu.memory_space<vmem>>, vector<2x16xf32>
    tpu.vector_store %arg3[%c0_129, %c448], %85 {strides = array<i32>} : memref<2x512xf32, #tpu.memory_space<vmem>>, vector<2x16xf32>,
    %c0_130 = arith.constant 0 : index
    %c1_131 = arith.constant 1 : index
    %c13_132 = arith.constant 13 : index
    %c0_133 = arith.constant 0 : index
    %87 = vector.load %arg2[%c0_130, %c1_131, %c13_132, %c0_133] : memref<2x2x16x16xf32, #tpu.memory_space<vmem>>, vector<2x1x1x16xf32>
    %88 = vector.shape_cast %87 : vector<2x1x1x16xf32> to vector<2x16xf32>
    %c0_134 = arith.constant 0 : index
    %c464 = arith.constant 464 : index
    %89 = vector.load %arg3[%c0_134, %c464] : memref<2x512xf32, #tpu.memory_space<vmem>>, vector<2x16xf32>
    tpu.vector_store %arg3[%c0_134, %c464], %88 {strides = array<i32>} : memref<2x512xf32, #tpu.memory_space<vmem>>, vector<2x16xf32>,
    %c0_135 = arith.constant 0 : index
    %c1_136 = arith.constant 1 : index
    %c14_137 = arith.constant 14 : index
    %c0_138 = arith.constant 0 : index
    %90 = vector.load %arg2[%c0_135, %c1_136, %c14_137, %c0_138] : memref<2x2x16x16xf32, #tpu.memory_space<vmem>>, vector<2x1x1x16xf32>
    %91 = vector.shape_cast %90 : vector<2x1x1x16xf32> to vector<2x16xf32>
    %c0_139 = arith.constant 0 : index
    %c480 = arith.constant 480 : index
    %92 = vector.load %arg3[%c0_139, %c480] : memref<2x512xf32, #tpu.memory_space<vmem>>, vector<2x16xf32>
    tpu.vector_store %arg3[%c0_139, %c480], %91 {strides = array<i32>} : memref<2x512xf32, #tpu.memory_space<vmem>>, vector<2x16xf32>,
    %c0_140 = arith.constant 0 : index
    %c1_141 = arith.constant 1 : index
    %c15_142 = arith.constant 15 : index
    %c0_143 = arith.constant 0 : index
    %93 = vector.load %arg2[%c0_140, %c1_141, %c15_142, %c0_143] : memref<2x2x16x16xf32, #tpu.memory_space<vmem>>, vector<2x1x1x16xf32>
    %94 = vector.shape_cast %93 : vector<2x1x1x16xf32> to vector<2x16xf32>
    %c0_144 = arith.constant 0 : index
    %c496 = arith.constant 496 : index
    %95 = vector.load %arg3[%c0_144, %c496] : memref<2x512xf32, #tpu.memory_space<vmem>>, vector<2x16xf32>
    tpu.vector_store %arg3[%c0_144, %c496], %94 {strides = array<i32>} : memref<2x512xf32, #tpu.memory_space<vmem>>, vector<2x16xf32>,
    return
  }
  func.func @transform_0(%arg0: i32, %arg1: i32) -> (i32, i32, i32, i32) {
    %c0_i32 = arith.constant 0 : i32
    %c0_i32_0 = arith.constant 0 : i32
    %c0_i32_1 = arith.constant 0 : i32
    return %arg0, %arg1, %c0_i32, %c0_i32_0 : i32, i32, i32, i32
  }
  func.func @transform_1(%arg0: i32, %arg1: i32) -> (i32, i32) {
    %c0_i32 = arith.constant 0 : i32
    return %arg0, %arg1 : i32, i32
  }
}

</mosaic_0001>

<bundles_post_ra>
// kernel: tpu_custom_call.1
= control target key start
LH: loop header
LB: loop body
LE: loop exit
PB: predicated region body
PF: predicated region fallthrough
CT: control target
= control target key end

     0   :  { %6 = vsyncpa [#allocation3], 0  ;;  %s1896_s0 = inlined_call_operand.hbm [shape: f32[2,4,16,16], index: 0, kind: input, shape index: {}]   ;;  %s1897_s1 = inlined_call_operand.hbm [shape: f32[2,1024], index: 1, kind: output, shape index: {}]  }
   0x1   :  { %8 = vsyncpa [#allocation3 + $0x1], 0 }
   0x2   :  { %9 = vsyncpa [#allocation4], 0 }
   0x3   :  { %11 = vsyncpa [#allocation4 + $0x1], 0  ;;  %s1519_s6 = smov 0   ;;  %s1521_s7 = smov 0  }
   0x4   :  { %s1523_s8 = smov 0   ;;  %s1525_s9 = smov 0  }
   0x5   :  { %s1527_s10 = smov 0   ;;  %s1529_s11 = smov 0  }
   0x6 LB: > { %s1219_s12 = sadd.s32 4294967295, %s1493_s11   ;;  %s1220_s13 = sadd.s32 4294967294, %s1493_s11   ;;  %s1493_s11 = sphi %s1529_s11, %s17_s11   ;;  %s1489_s10 = sphi %s1527_s10, %s1906_s10   ;;  %s1485_s9 = sphi %s1525_s9, %s1905_s9   ;;  %s1481_s8 = sphi %s1523_s8, %s1904_s8   ;;  %s1477_s7 = sphi %s1521_s7, %s1903_s7   ;;  %s1473_s6 = sphi %s1519_s6, %s1902_s6  }
   0x7   : > { %s26_s14 = sadd.s32 1, %s1489_s10  ;;  %s38_s15 = sadd.s32 1, %s1481_s8 }
   0x8   : > { %p27_p0 = scmp.ge.s32.totalorder %s26_s14, 2  ;;  %p45_p1 = scmp.ne.s32.totalorder %s1481_s8, %s1477_s7 }
   0x9   : > { %p46_p2 = scmp.eq.s32.totalorder %s1493_s11, 0  ;;  %p51_p3 = scmp.ne.s32.totalorder %s1477_s7, %s1473_s6 }
   0xa   : > { %s1908_s14 = smov (%p27_p0, %s26_s14), 0  ;;  %p52_p5 = scmp.eq.s32.totalorder %s1219_s12, 0 }
   0xb   : > { %p1560_p4 = por %p46_p2, %p45_p1  ;;  %s34_s17 = ssub.s32 %s1489_s10, %s1908_s14 }
   0xc   : > { %p77_p6 = scmp.eq.s32.totalorder %s1219_s12, 1  ;;  %p36_p7 = scmp.eq.s32.totalorder %s34_s17, 0 }
   0xd   : > { %p1566_p8 = por %p52_p5, %p51_p3  ;;  %p83_p10 = scmp.eq.s32.totalorder %s1220_s13, 1 }
   0xe   : > { %p1570_p9 = por %p77_p6, %p45_p1  ;;  %p1222_p12 = scmp.ge.s32.totalorder %s1493_s11, 2 }
   0xf   : > { %s1575_s20 = scalar_select %p36_p7, %s1481_s8, %s38_s15  }
  0x10   : > { %p1577_p11 = por %p83_p10, %p51_p3  ;;  %99 = sbr.rel (%p1222_p12) target bundleno = 34 (0x22), region = 16 }
  0x15   : > { %s103_s22 = sand.u32 1, %s1481_s8   ;;  %s1334_s23 = sshll.u32 %s1489_s10, 9 }
  0x16   : > { %s1223_s24 = sshll.u32 %s103_s22, 6  ;;  %s117_s27 = scalar_lea.hbm %s1896_s0, %s1334_s23 }
  0x17   : > { %s1336_s28 = scalar_select %p1560_p4, [#allocation0], [#allocation8] }
  0x18   : > { %s107_s29 = scalar_lea.vmem [#allocation2], %s1223_s24  ;;  %s1495_s3 = smov 1024  }
  0x19   : > { %s130_s30 = sshll.u32 %s107_s29, 4  ;;  %s122_s2 = sld [smem:[%s1336_s28]]   ;;  %s131_s30 = int_to_ptr.vmem [resolvable:$true] %s130_s30 }
  0x1a   : > { %1337 = sst [smem:[#allocation7]] (%p1560_p4), %s1495_s3  ;;  %s1496_s4 = smov 512  }
  0x1b   : > { %1338 = sst [smem:[#allocation7 + $0x1]] (%p1560_p4), %s1496_s4  ;;  %s1497_s5 = smov 4  }
  0x1c   : > { %1339 = sst [smem:[#allocation7 + $0x2]] (%p1560_p4), %s1497_s5  ;;  %s1498_s12 = smov 128  }
  0x1d   : > { %1340 = sst [smem:[#allocation7 + $0x3]] (%p1560_p4), %s1498_s12  ;;  %s1499_s15 = smov 8  }
  0x1e   : > { %1341 = sst [smem:[#allocation7 + $0x4]] (%p1560_p4), %s1498_s12  ;;  %s104_s23 = scalar_lea.sflag [#allocation3], %s103_s22 }
  0x1f   : > { %s1227_s13 = sshll.u32 %s122_s2, 26  ;;  %1342 = sst [smem:[#allocation7 + $0x5]] (%p1560_p4), %s1499_s15 }
  0x20   : > { %s1228_s17 = sadd.s32 134217728, %s1227_s13  ;;  %s1500_s24 = smov 131072  }
  0x21   : > { %1343 = dma.general (%p1560_p4), %s117_s27, 1024, %s131_s30, %s104_s23, %s1500_s24, [#allocation7], %s1228_s17, 0  }
  0x22 PF: > { %p1229_p13 = scmp.ge.s32.totalorder %s1493_s11, 1  ;;  %p151_p0 = scmp.lt.s32.totalorder %s1493_s11, 3 }
  0x24   : > { %p152_p1 = pnand %p1229_p13, %p151_p0 }
  0x25   : > { %s1608_s25 = sand.u32 (!%p152_p1), 1, %s1477_s7  }
  0x26   : > { %155 = sbr.rel (%p152_p1) target bundleno = 234 (0xea), region = 24  ;;  %s1230_s26 = sshll.u32 (!%p152_p1), %s1608_s25, 6 }
  0x27   : > { %s158_s28 = scalar_lea.sflag (!%p152_p1), [#allocation3], %s1608_s25  ;;  %s1612_s29 = scalar_lea.vmem (!%p152_p1), [#allocation2], %s1230_s26 }
  0x2b   : > { %1464 = dma.done.wait (%p1566_p8), %s158_s28, 1024  }
  0x2c   : > { %1466 = vsyncadd (%p1566_p8), %s158_s28, 4294966272  ;;  %v1270_v0 = vld.sshfl [vmem:[%s1612_s29 + $0x11] sm:$0x1 pattern:$0x76325410]  ;;  %vm206_vm0 = vcmask 1041409  }
  0x2d   : > { %v1271_v1 = vld.sshfl [vmem:[%s1612_s29 + $0x31] sm:$0x1 pattern:$0x76325410]  ;;  %vm208_vm1 = vcmask 1043459   ;;  %vm210_vm2 = vcmask 1045509  }
  0x2e   : > { %v705_v2 = vrot.slane %v1271_v1, 7  ;;  %v1234_v3 = vld.sshfl [vmem:[%s1612_s29 + $0x1] sm:$0x1 pattern:$0x76325410]  ;;  %vm212_vm3 = vcmask 1047559  }
  0x2f   : > { %v1235_v4 = vld.sshfl [vmem:[%s1612_s29 + $0x21] sm:$0x1 pattern:$0x76325410]  ;;  %s1501_s16 = smov 16   ;;  %s1502_s18 = smov 32  }
  0x30   : > { %v706_v5 = vsel %vm206_vm0, %v705_v2, %v1270_v0  ;;  %v237_v6 = vrot.slane %v1235_v4, 7  ;;  %v1302_v7 = vld.sshfl [vmem:[%s1612_s29 + $0x19] sm:$0x1 pattern:$0x76325410]  ;;  %s1503_s22 = smov 48  }
  0x31   : > { %v707_v8 = vsel %vm208_vm1, %v705_v2, %v706_v5  ;;  %v1303_v9 = vld.sshfl [vmem:[%s1612_s29 + $0x39] sm:$0x1 pattern:$0x76325410]  ;;  %s1504_s27 = smov 64   ;;  %s1505_s30 = smov 80  }
  0x32   : > { %v708_v10 = vsel %vm210_vm2, %v705_v2, %v707_v8  ;;  %v238_v11 = vsel %vm206_vm0, %v237_v6, %v1234_v3  ;;  %v935_v12 = vrot.slane %v1303_v9, 7  ;;  %v1250_v13 = vld.sshfl [vmem:[%s1612_s29 + $0x9] sm:$0x1 pattern:$0x76325410]  ;;  %s1506_s2 = smov 96  }
  0x33   : > { %v709_v14 = vsel %vm212_vm3, %v705_v2, %v708_v10  ;;  %v239_v15 = vsel %vm208_vm1, %v237_v6, %v238_v11  ;;  %v1251_v16 = vld.sshfl [vmem:[%s1612_s29 + $0x29] sm:$0x1 pattern:$0x76325410]  ;;  %s1507_s3 = smov 112   ;;  %s1231_s4 = sshll.u32 %s1608_s25, 3 }
  0x34   : > { %710 = vrot.lane.b32.xlu1 %v709_v14, %s1501_s16  ;;  %v240_v17 = vsel %vm210_vm2, %v237_v6, %v239_v15  ;;  %v936_v18 = vsel %vm206_vm0, %v935_v12, %v1302_v7  ;;  %v474_v19 = vrot.slane %v1251_v16, 7  ;;  %v1252_v20 = vld.sshfl [vmem:[%s1612_s29 + $0xa] sm:$0x1 pattern:$0x76325410]  ;;  %vm215_vm4 = vcmask 123904  }
  0x35   : > { %v241_v21 = vsel %vm212_vm3, %v237_v6, %v240_v17  ;;  %v937_v22 = vsel %vm208_vm1, %v935_v12, %v936_v18  ;;  %v1253_v23 = vld.sshfl [vmem:[%s1612_s29 + $0x2a] sm:$0x1 pattern:$0x76325410]  ;;  %s1801_s5 = scalar_lea.vmem [#allocation5], %s1231_s4  ;;  %vm245_vm5 = vcmask 255104  }
  0x36   : > { %242 = vrot.lane.b32.xlu0 %v241_v21, %s1501_s16  ;;  %v938_v24 = vsel %vm210_vm2, %v935_v12, %v937_v22  ;;  %v475_v25 = vsel %vm206_vm0, %v474_v19, %v1250_v13  ;;  %v503_v26 = vrot.slane %v1253_v23, 7  ;;  %v1236_v27 = vld.sshfl [vmem:[%s1612_s29 + $0x2] sm:$0x1 pattern:$0x76325410]  ;;  %vm275_vm6 = vcmask 386304  }
  0x37   : > { %v939_v28 = vsel %vm212_vm3, %v935_v12, %v938_v24  ;;  %v476_v29 = vsel %vm208_vm1, %v474_v19, %v475_v25  ;;  %v1237_v30 = vld.sshfl [vmem:[%s1612_s29 + $0x22] sm:$0x1 pattern:$0x76325410]  ;;  %vm305_vm7 = vcmask 517504   ;;  %vm335_vm8 = vcmask 648704  }
  0x38   : > { %940 = vrot.lane.b32.xlu1 %v939_v28, %s1501_s16  ;;  %v477_v31 = vsel %vm210_vm2, %v474_v19, %v476_v29  ;;  %v504_v32 = vsel %vm206_vm0, %v503_v26, %v1252_v20  ;;  %v267_v33 = vrot.slane %v1237_v30, 7  ;;  %v1306_v34 = vld.sshfl [vmem:[%s1612_s29 + $0x1a] sm:$0x1 pattern:$0x76325410]  ;;  %vm365_vm9 = vcmask 779904  }
  0x39   : > { %v478_v35 = vsel %vm212_vm3, %v474_v19, %v477_v31  ;;  %v505_v36 = vsel %vm208_vm1, %v503_v26, %v504_v32  ;;  %v1307_v37 = vld.sshfl [vmem:[%s1612_s29 + $0x3a] sm:$0x1 pattern:$0x76325410]  ;;  %vm395_vm10 = vcmask 911104   ;;  %vm425_vm11 = vcmask 1042304  }
  0x3a   : > { %479 = vrot.lane.b32.xlu0 %v478_v35, %s1501_s16  ;;  %v506_v38 = vsel %vm210_vm2, %v503_v26, %v505_v36  ;;  %v268_v39 = vsel %vm206_vm0, %v267_v33, %v1236_v27  ;;  %v964_v40 = vrot.slane %v1307_v37, 7  ;;  %v1274_v41 = vld.sshfl [vmem:[%s1612_s29 + $0x12] sm:$0x1 pattern:$0x76325410]  ;;  %s1335_s12 = sshll.u32 %s1485_s9, 7 }
  0x3b   : > { %v507_v42 = vsel %vm212_vm3, %v503_v26, %v506_v38  ;;  %v269_v43 = vsel %vm208_vm1, %v267_v33, %v268_v39  ;;  %v1275_v44 = vld.sshfl [vmem:[%s1612_s29 + $0x32] sm:$0x1 pattern:$0x76325410]  ;;  %s1135_s13 = sshll.u32 %s1801_s5, 4  ;;  %s1853_s23 = scalar_lea.hbm %s1897_s1, %s1335_s12  ;;  %s1136_s13 = int_to_ptr.vmem [resolvable:$true] %s1135_s13 }
  0x3c   : > { %508 = vrot.lane.b32.xlu1 %v507_v42, %s1502_s18  ;;  %v270_v45 = vsel %vm210_vm2, %v267_v33, %v269_v43  ;;  %v965_v46 = vsel %vm206_vm0, %v964_v40, %v1306_v34  ;;  %v734_v47 = vrot.slane %v1275_v44, 7  ;;  %v1254_v48 = vld.sshfl [vmem:[%s1612_s29 + $0xb] sm:$0x1 pattern:$0x76325410]  ;;  %s1119_s24 = scalar_lea.sflag [#allocation4], %s1608_s25 }
  0x3d   : > { %v271_v49 = vsel %vm212_vm3, %v267_v33, %v270_v45  ;;  %v966_v50 = vsel %vm208_vm1, %v964_v40, %v965_v46  ;;  %v1255_v51 = vld.sshfl [vmem:[%s1612_s29 + $0x2b] sm:$0x1 pattern:$0x76325410]  ;;  %s1413_s26 = scalar_lea.vmem %s1136_s13, 128  ;;  %s1508_s28 = smov [#allocation5]  }
  0x3e   : > { %272 = vrot.lane.b32.xlu0 %v271_v49, %s1502_s18  ;;  %v967_v52 = vsel %vm210_vm2, %v964_v40, %v966_v50  ;;  %v735_v53 = vsel %vm206_vm0, %v734_v47, %v1274_v41  ;;  %v532_v54 = vrot.slane %v1255_v51, 7  ;;  %v1238_v55 = vld.sshfl [vmem:[%s1612_s29 + $0x3] sm:$0x1 pattern:$0x76325410]  ;;  %p1414_p2 = scmp.ne.s32.totalorder %s1136_s13, %s1413_s26  ;;  %s1417_s9 = sshll.u32 %s1508_s28, 4  ;;  %s1418_s9 = int_to_ptr.vmem [resolvable:$false] %s1417_s9 }
  0x3f   : > { %v968_v56 = vsel %vm212_vm3, %v964_v40, %v967_v52  ;;  %v736_v57 = vsel %vm208_vm1, %v734_v47, %v735_v53  ;;  %v1239_v58 = vld.sshfl [vmem:[%s1612_s29 + $0x23] sm:$0x1 pattern:$0x76325410]  ;;  %p1420_p5 = scmp.lt.s32.totalorder %s1136_s13, %s1418_s9 }
  0x40   : > { %969 = vrot.lane.b32.xlu1 %v968_v56, %s1502_s18  ;;  %v737_v59 = vsel %vm210_vm2, %v734_v47, %v736_v57  ;;  %v533_v60 = vsel %vm206_vm0, %v532_v54, %v1254_v48  ;;  %v297_v61 = vrot.slane %v1239_v58, 7  ;;  %v1310_v62 = vld.sshfl [vmem:[%s1612_s29 + $0x1b] sm:$0x1 pattern:$0x76325410]  ;;  %p1415_p3 = pnand %p1414_p2, %p1570_p9 }
  0x41   : > { %v738_v63 = vsel %vm212_vm3, %v734_v47, %v737_v59  ;;  %v534_v0 = vsel %vm208_vm1, %v532_v54, %v533_v60  ;;  %v1311_v1 = vld.sshfl [vmem:[%s1612_s29 + $0x3b] sm:$0x1 pattern:$0x76325410] }
  0x42   : > { %739 = vrot.lane.b32.xlu0 %v738_v63, %s1502_s18  ;;  %v535_v2 = vsel %vm210_vm2, %v532_v54, %v534_v0  ;;  %v298_v3 = vsel %vm206_vm0, %v297_v61, %v1238_v55  ;;  %v993_v4 = vrot.slane %v1311_v1, 7  ;;  %v1278_v5 = vld.sshfl [vmem:[%s1612_s29 + $0x13] sm:$0x1 pattern:$0x76325410]  ;;  %p1416_p4 = pneg %p1415_p3 }
  0x43   : > { %v536_v6 = vsel %vm212_vm3, %v532_v54, %v535_v2  ;;  %v299_v7 = vsel %vm208_vm1, %v297_v61, %v298_v3  ;;  %v1279_v8 = vld.sshfl [vmem:[%s1612_s29 + $0x33] sm:$0x1 pattern:$0x76325410] }
  0x44   : > { %537 = vrot.lane.b32.xlu1 %v536_v6, %s1503_s22  ;;  %v300_v9 = vsel %vm210_vm2, %v297_v61, %v299_v7  ;;  %v994_v10 = vsel %vm206_vm0, %v993_v4, %v1310_v62  ;;  %v763_v11 = vrot.slane %v1279_v8, 7  ;;  %v1256_v12 = vld.sshfl [vmem:[%s1612_s29 + $0xc] sm:$0x1 pattern:$0x76325410] }
  0x45   : > { %v301_v13 = vsel %vm212_vm3, %v297_v61, %v300_v9  ;;  %v995_v14 = vsel %vm208_vm1, %v993_v4, %v994_v10  ;;  %v1257_v15 = vld.sshfl [vmem:[%s1612_s29 + $0x2c] sm:$0x1 pattern:$0x76325410] }
  0x46   : > { %302 = vrot.lane.b32.xlu0 %v301_v13, %s1503_s22  ;;  %v996_v16 = vsel %vm210_vm2, %v993_v4, %v995_v14  ;;  %v764_v17 = vsel %vm206_vm0, %v763_v11, %v1278_v5  ;;  %v561_v18 = vrot.slane %v1257_v15, 7  ;;  %v1240_v19 = vld.sshfl [vmem:[%s1612_s29 + $0x4] sm:$0x1 pattern:$0x76325410] }
  0x47   : > { %v997_v20 = vsel %vm212_vm3, %v993_v4, %v996_v16  ;;  %v765_v21 = vsel %vm208_vm1, %v763_v11, %v764_v17  ;;  %v1241_v22 = vld.sshfl [vmem:[%s1612_s29 + $0x24] sm:$0x1 pattern:$0x76325410] }
  0x48   : > { %998 = vrot.lane.b32.xlu1 %v997_v20, %s1503_s22  ;;  %v766_v23 = vsel %vm210_vm2, %v763_v11, %v765_v21  ;;  %v562_v24 = vsel %vm206_vm0, %v561_v18, %v1256_v12  ;;  %v327_v25 = vrot.slane %v1241_v22, 7  ;;  %v1314_v26 = vld.sshfl [vmem:[%s1612_s29 + $0x1c] sm:$0x1 pattern:$0x76325410] }
  0x49   : > { %v767_v27 = vsel %vm212_vm3, %v763_v11, %v766_v23  ;;  %v563_v28 = vsel %vm208_vm1, %v561_v18, %v562_v24  ;;  %v1315_v29 = vld.sshfl [vmem:[%s1612_s29 + $0x3c] sm:$0x1 pattern:$0x76325410] }
  0x4a   : > { %768 = vrot.lane.b32.xlu0 %v767_v27, %s1503_s22  ;;  %v564_v30 = vsel %vm210_vm2, %v561_v18, %v563_v28  ;;  %v328_v31 = vsel %vm206_vm0, %v327_v25, %v1240_v19  ;;  %v1022_v32 = vrot.slane %v1315_v29, 7  ;;  %v1282_v33 = vld.sshfl [vmem:[%s1612_s29 + $0x14] sm:$0x1 pattern:$0x76325410] }
  0x4b   : > { %v565_v34 = vsel %vm212_vm3, %v561_v18, %v564_v30  ;;  %v329_v35 = vsel %vm208_vm1, %v327_v25, %v328_v31  ;;  %v1283_v36 = vld.sshfl [vmem:[%s1612_s29 + $0x34] sm:$0x1 pattern:$0x76325410] }
  0x4c   : > { %566 = vrot.lane.b32.xlu1 %v565_v34, %s1504_s27  ;;  %v330_v37 = vsel %vm210_vm2, %v327_v25, %v329_v35  ;;  %v1023_v38 = vsel %vm206_vm0, %v1022_v32, %v1314_v26  ;;  %v792_v39 = vrot.slane %v1283_v36, 7  ;;  %v1258_v40 = vld.sshfl [vmem:[%s1612_s29 + $0xd] sm:$0x1 pattern:$0x76325410] }
  0x4d   : > { %v331_v41 = vsel %vm212_vm3, %v327_v25, %v330_v37  ;;  %v1024_v42 = vsel %vm208_vm1, %v1022_v32, %v1023_v38  ;;  %v1259_v43 = vld.sshfl [vmem:[%s1612_s29 + $0x2d] sm:$0x1 pattern:$0x76325410] }
  0x4e   : > { %332 = vrot.lane.b32.xlu0 %v331_v41, %s1504_s27  ;;  %v1025_v44 = vsel %vm210_vm2, %v1022_v32, %v1024_v42  ;;  %v793_v45 = vsel %vm206_vm0, %v792_v39, %v1282_v33  ;;  %v590_v46 = vrot.slane %v1259_v43, 7  ;;  %v1242_v47 = vld.sshfl [vmem:[%s1612_s29 + $0x5] sm:$0x1 pattern:$0x76325410] }
  0x4f   : > { %v1026_v48 = vsel %vm212_vm3, %v1022_v32, %v1025_v44  ;;  %v794_v49 = vsel %vm208_vm1, %v792_v39, %v793_v45  ;;  %v1243_v50 = vld.sshfl [vmem:[%s1612_s29 + $0x25] sm:$0x1 pattern:$0x76325410] }
  0x50   : > { %1027 = vrot.lane.b32.xlu1 %v1026_v48, %s1504_s27  ;;  %v795_v51 = vsel %vm210_vm2, %v792_v39, %v794_v49  ;;  %v591_v52 = vsel %vm206_vm0, %v590_v46, %v1258_v40  ;;  %v357_v53 = vrot.slane %v1243_v50, 7  ;;  %v1318_v54 = vld.sshfl [vmem:[%s1612_s29 + $0x1d] sm:$0x1 pattern:$0x76325410] }
  0x51   : > { %v796_v55 = vsel %vm212_vm3, %v792_v39, %v795_v51  ;;  %v592_v56 = vsel %vm208_vm1, %v590_v46, %v591_v52  ;;  %v1319_v57 = vld.sshfl [vmem:[%s1612_s29 + $0x3d] sm:$0x1 pattern:$0x76325410] }
  0x52   : > { %797 = vrot.lane.b32.xlu0 %v796_v55, %s1504_s27  ;;  %v593_v58 = vsel %vm210_vm2, %v590_v46, %v592_v56  ;;  %v358_v59 = vsel %vm206_vm0, %v357_v53, %v1242_v47  ;;  %v1051_v60 = vrot.slane %v1319_v57, 7  ;;  %v1286_v61 = vld.sshfl [vmem:[%s1612_s29 + $0x15] sm:$0x1 pattern:$0x76325410] }
  0x53   : > { %v594_v62 = vsel %vm212_vm3, %v590_v46, %v593_v58  ;;  %v359_v63 = vsel %vm208_vm1, %v357_v53, %v358_v59  ;;  %v1287_v0 = vld.sshfl [vmem:[%s1612_s29 + $0x35] sm:$0x1 pattern:$0x76325410] }
  0x54   : > { %595 = vrot.lane.b32.xlu1 %v594_v62, %s1505_s30  ;;  %v360_v1 = vsel %vm210_vm2, %v357_v53, %v359_v63  ;;  %v1052_v2 = vsel %vm206_vm0, %v1051_v60, %v1318_v54  ;;  %v821_v3 = vrot.slane %v1287_v0, 7  ;;  %v1260_v4 = vld.sshfl [vmem:[%s1612_s29 + $0xe] sm:$0x1 pattern:$0x76325410] }
  0x55   : > { %v361_v5 = vsel %vm212_vm3, %v357_v53, %v360_v1  ;;  %v1053_v6 = vsel %vm208_vm1, %v1051_v60, %v1052_v2  ;;  %v1261_v7 = vld.sshfl [vmem:[%s1612_s29 + $0x2e] sm:$0x1 pattern:$0x76325410] }
  0x56   : > { %362 = vrot.lane.b32.xlu0 %v361_v5, %s1505_s30  ;;  %v1054_v8 = vsel %vm210_vm2, %v1051_v60, %v1053_v6  ;;  %v822_v9 = vsel %vm206_vm0, %v821_v3, %v1286_v61  ;;  %v619_v10 = vrot.slane %v1261_v7, 7  ;;  %v1244_v11 = vld.sshfl [vmem:[%s1612_s29 + $0x6] sm:$0x1 pattern:$0x76325410] }
  0x57   : > { %v1055_v12 = vsel %vm212_vm3, %v1051_v60, %v1054_v8  ;;  %v823_v13 = vsel %vm208_vm1, %v821_v3, %v822_v9  ;;  %v1245_v14 = vld.sshfl [vmem:[%s1612_s29 + $0x26] sm:$0x1 pattern:$0x76325410] }
  0x58   : > { %1056 = vrot.lane.b32.xlu1 %v1055_v12, %s1505_s30  ;;  %v824_v15 = vsel %vm210_vm2, %v821_v3, %v823_v13  ;;  %v620_v16 = vsel %vm206_vm0, %v619_v10, %v1260_v4  ;;  %v387_v17 = vrot.slane %v1245_v14, 7  ;;  %v1322_v18 = vld.sshfl [vmem:[%s1612_s29 + $0x1e] sm:$0x1 pattern:$0x76325410] }
  0x59   : > { %v825_v19 = vsel %vm212_vm3, %v821_v3, %v824_v15  ;;  %v621_v20 = vsel %vm208_vm1, %v619_v10, %v620_v16  ;;  %v1323_v21 = vld.sshfl [vmem:[%s1612_s29 + $0x3e] sm:$0x1 pattern:$0x76325410] }
  0x5a   : > { %826 = vrot.lane.b32.xlu0 %v825_v19, %s1505_s30  ;;  %v622_v22 = vsel %vm210_vm2, %v619_v10, %v621_v20  ;;  %v388_v23 = vsel %vm206_vm0, %v387_v17, %v1244_v11  ;;  %v1080_v24 = vrot.slane %v1323_v21, 7  ;;  %v1290_v25 = vld.sshfl [vmem:[%s1612_s29 + $0x16] sm:$0x1 pattern:$0x76325410] }
  0x5b   : > { %v623_v26 = vsel %vm212_vm3, %v619_v10, %v622_v22  ;;  %v389_v27 = vsel %vm208_vm1, %v387_v17, %v388_v23  ;;  %v1291_v28 = vld.sshfl [vmem:[%s1612_s29 + $0x36] sm:$0x1 pattern:$0x76325410] }
  0x5c   : > { %624 = vrot.lane.b32.xlu1 %v623_v26, %s1506_s2  ;;  %v390_v29 = vsel %vm210_vm2, %v387_v17, %v389_v27  ;;  %v1081_v30 = vsel %vm206_vm0, %v1080_v24, %v1322_v18  ;;  %v850_v31 = vrot.slane %v1291_v28, 7  ;;  %v1262_v32 = vld.sshfl [vmem:[%s1612_s29 + $0xf] sm:$0x1 pattern:$0x76325410] }
  0x5d   : > { %v391_v33 = vsel %vm212_vm3, %v387_v17, %v390_v29  ;;  %v1082_v34 = vsel %vm208_vm1, %v1080_v24, %v1081_v30  ;;  %v1263_v35 = vld.sshfl [vmem:[%s1612_s29 + $0x2f] sm:$0x1 pattern:$0x76325410] }
  0x5e   : > { %392 = vrot.lane.b32.xlu0 %v391_v33, %s1506_s2  ;;  %v1083_v36 = vsel %vm210_vm2, %v1080_v24, %v1082_v34  ;;  %v851_v37 = vsel %vm206_vm0, %v850_v31, %v1290_v25  ;;  %v648_v38 = vrot.slane %v1263_v35, 7  ;;  %v1246_v39 = vld.sshfl [vmem:[%s1612_s29 + $0x7] sm:$0x1 pattern:$0x76325410] }
  0x5f   : > { %v1084_v40 = vsel %vm212_vm3, %v1080_v24, %v1083_v36  ;;  %v852_v41 = vsel %vm208_vm1, %v850_v31, %v851_v37  ;;  %v1247_v42 = vld.sshfl [vmem:[%s1612_s29 + $0x27] sm:$0x1 pattern:$0x76325410] }
  0x60   : > { %1085 = vrot.lane.b32.xlu1 %v1084_v40, %s1506_s2  ;;  %v853_v43 = vsel %vm210_vm2, %v850_v31, %v852_v41  ;;  %v649_v44 = vsel %vm206_vm0, %v648_v38, %v1262_v32  ;;  %v417_v45 = vrot.slane %v1247_v42, 7  ;;  %v1326_v46 = vld.sshfl [vmem:[%s1612_s29 + $0x1f] sm:$0x1 pattern:$0x76325410] }
  0x61   : > { %v854_v47 = vsel %vm212_vm3, %v850_v31, %v853_v43  ;;  %v650_v48 = vsel %vm208_vm1, %v648_v38, %v649_v44  ;;  %v1327_v49 = vld.sshfl [vmem:[%s1612_s29 + $0x3f] sm:$0x1 pattern:$0x76325410] }
  0x62   : > { %855 = vrot.lane.b32.xlu0 %v854_v47, %s1506_s2  ;;  %v651_v50 = vsel %vm210_vm2, %v648_v38, %v650_v48  ;;  %v418_v51 = vsel %vm206_vm0, %v417_v45, %v1246_v39  ;;  %v1109_v52 = vrot.slane %v1327_v49, 7  ;;  %v1294_v53 = vld.sshfl [vmem:[%s1612_s29 + $0x17] sm:$0x1 pattern:$0x76325410] }
  0x63   : > { %v652_v54 = vsel %vm212_vm3, %v648_v38, %v651_v50  ;;  %v419_v55 = vsel %vm208_vm1, %v417_v45, %v418_v51  ;;  %v1295_v56 = vld.sshfl [vmem:[%s1612_s29 + $0x37] sm:$0x1 pattern:$0x76325410] }
  0x64   : > { %653 = vrot.lane.b32.xlu1 %v652_v54, %s1507_s3  ;;  %v420_v57 = vsel %vm210_vm2, %v417_v45, %v419_v55  ;;  %v1110_v58 = vsel %vm206_vm0, %v1109_v52, %v1326_v46  ;;  %v879_v59 = vrot.slane %v1295_v56, 7  ;;  %v1266_v60 = vld.sshfl [vmem:[%s1612_s29 + $0x10] sm:$0x1 pattern:$0x76325410] }
  0x65   : > { %v421_v61 = vsel %vm212_vm3, %v417_v45, %v420_v57  ;;  %v1111_v62 = vsel %vm208_vm1, %v1109_v52, %v1110_v58  ;;  %v1267_v63 = vld.sshfl [vmem:[%s1612_s29 + $0x30] sm:$0x1 pattern:$0x76325410] }
  0x66   : > { %422 = vrot.lane.b32.xlu0 %v421_v61, %s1507_s3  ;;  %v1112_v0 = vsel %vm210_vm2, %v1109_v52, %v1111_v62  ;;  %v880_v1 = vsel %vm206_vm0, %v879_v59, %v1294_v53  ;;  %v678_v2 = vrot.slane %v1267_v63, 7  ;;  %v1232_v3 = vld.sshfl [vmem:[%s1612_s29] sm:$0x1 pattern:$0x76325410] }
  0x67   : > { %v1113_v4 = vsel %vm212_vm3, %v1109_v52, %v1112_v0  ;;  %v881_v5 = vsel %vm208_vm1, %v879_v59, %v880_v1  ;;  %v1233_v6 = vld.sshfl [vmem:[%s1612_s29 + $0x20] sm:$0x1 pattern:$0x76325410] }
  0x68   : > { %1114 = vrot.lane.b32.xlu1 %v1113_v4, %s1507_s3  ;;  %v882_v7 = vsel %vm210_vm2, %v879_v59, %v881_v5  ;;  %v679_v8 = vsel %vm206_vm0, %v678_v2, %v1266_v60  ;;  %v205_v9 = vrot.slane %v1233_v6, 7  ;;  %v1298_v10 = vld.sshfl [vmem:[%s1612_s29 + $0x18] sm:$0x1 pattern:$0x76325410] }
  0x69   : > { %v883_v11 = vsel %vm212_vm3, %v879_v59, %v882_v7  ;;  %v680_v12 = vsel %vm208_vm1, %v678_v2, %v679_v8  ;;  %v1299_v13 = vld.sshfl [vmem:[%s1612_s29 + $0x38] sm:$0x1 pattern:$0x76325410] }
  0x6a   : > { %884 = vrot.lane.b32.xlu0 %v883_v11, %s1507_s3  ;;  %v681_v14 = vsel %vm210_vm2, %v678_v2, %v680_v12  ;;  %v207_v15 = vsel %vm206_vm0, %v205_v9, %v1232_v3  ;;  %v908_v16 = vrot.slane %v1299_v13, 7  ;;  %v1248_v17 = vld.sshfl [vmem:[%s1612_s29 + $0x8] sm:$0x1 pattern:$0x76325410] }
  0x6b   : > { %v682_v18 = vsel %vm212_vm3, %v678_v2, %v681_v14  ;;  %v209_v19 = vsel %vm208_vm1, %v205_v9, %v207_v15  ;;  %v1249_v20 = vld.sshfl [vmem:[%s1612_s29 + $0x28] sm:$0x1 pattern:$0x76325410]  ;;  %s1419_s29 = scalar_lea.vmem %s1418_s9, 256 }
  0x6c   : > { %684 = vst.msk [vmem:[%s1801_s5 + $0x4] sm:$0x3] %vm215_vm4, %v682_v18  ;;  %v211_v21 = vsel %vm210_vm2, %v205_v9, %v209_v19  ;;  %v909_v22 = vsel %vm206_vm0, %v908_v16, %v1298_v10  ;;  %v447_v23 = vrot.slane %v1249_v20, 7  ;;  %p1421_p6 = scmp.lt.s32.totalorder %s1419_s29, %s1413_s26 }
  0x6d   : > { %v213_v24 = vsel %vm212_vm3, %v205_v9, %v211_v21  ;;  %v910_v25 = vsel %vm208_vm1, %v908_v16, %v909_v22 }
  0x6e   : > { %216 = vst.msk [vmem:[%s1801_s5] sm:$0x3] %vm215_vm4, %v213_v24  ;;  %v911_v26 = vsel %vm210_vm2, %v908_v16, %v910_v25  ;;  %v448_v27 = vsel %vm206_vm0, %v447_v23, %v1248_v17  ;;  %p1422_p7 = por %p1421_p6, %p1420_p5 }
  0x6f   : > { %v912_v28 = vsel %vm212_vm3, %v908_v16, %v911_v26  ;;  %v449_v29 = vsel %vm208_vm1, %v447_v23, %v448_v27 }
  0x70   : > { %914 = vst.msk [vmem:[%s1801_s5 + $0x6] sm:$0x3] %vm215_vm4, %v912_v28  ;;  %v450_v30 = vsel %vm210_vm2, %v447_v23, %v449_v29  ;;  %p1423_p8 = pnand %p1422_p7, %p1416_p4 }
  0x71   : > { %v451_v31 = vsel %vm212_vm3, %v447_v23, %v450_v30 }
  0x72   : > { %453 = vst.msk [vmem:[%s1801_s5 + $0x2] sm:$0x3] %vm215_vm4, %v451_v31 }
  0xa6   : > { %v711_v32 = vpop.permute.xlu1 %710 }
  0xa7   : > { %713 = vst.msk [vmem:[%s1801_s5 + $0x4] sm:$0x3] %vm245_vm5, %v711_v32 }
  0xa8   : > { %v243_v33 = vpop.permute.xlu0 %242 }
  0xa9   : > { %246 = vst.msk [vmem:[%s1801_s5] sm:$0x3] %vm245_vm5, %v243_v33 }
  0xaa   : > { %v941_v34 = vpop.permute.xlu1 %940 }
  0xab   : > { %943 = vst.msk [vmem:[%s1801_s5 + $0x6] sm:$0x3] %vm245_vm5, %v941_v34 }
  0xac   : > { %v480_v35 = vpop.permute.xlu0 %479 }
  0xad   : > { %482 = vst.msk [vmem:[%s1801_s5 + $0x2] sm:$0x3] %vm245_vm5, %v480_v35 }
  0xae   : > { %v509_v36 = vpop.permute.xlu1 %508 }
  0xaf   : > { %511 = vst.msk [vmem:[%s1801_s5 + $0x2] sm:$0x3] %vm275_vm6, %v509_v36 }
  0xb0   : > { %v273_v37 = vpop.permute.xlu0 %272 }
  0xb1   : > { %276 = vst.msk [vmem:[%s1801_s5] sm:$0x3] %vm275_vm6, %v273_v37 }
  0xb2   : > { %v970_v38 = vpop.permute.xlu1 %969 }
  0xb3   : > { %972 = vst.msk [vmem:[%s1801_s5 + $0x6] sm:$0x3] %vm275_vm6, %v970_v38 }
  0xb4   : > { %v740_v39 = vpop.permute.xlu0 %739 }
  0xb5   : > { %742 = vst.msk [vmem:[%s1801_s5 + $0x4] sm:$0x3] %vm275_vm6, %v740_v39 }
  0xb6   : > { %v538_v40 = vpop.permute.xlu1 %537 }
  0xb7   : > { %540 = vst.msk [vmem:[%s1801_s5 + $0x2] sm:$0x3] %vm305_vm7, %v538_v40 }
  0xb8   : > { %v303_v41 = vpop.permute.xlu0 %302 }
  0xb9   : > { %306 = vst.msk [vmem:[%s1801_s5] sm:$0x3] %vm305_vm7, %v303_v41 }
  0xba   : > { %v999_v42 = vpop.permute.xlu1 %998 }
  0xbb   : > { %1001 = vst.msk [vmem:[%s1801_s5 + $0x6] sm:$0x3] %vm305_vm7, %v999_v42 }
  0xbc   : > { %v769_v43 = vpop.permute.xlu0 %768 }
  0xbd   : > { %771 = vst.msk [vmem:[%s1801_s5 + $0x4] sm:$0x3] %vm305_vm7, %v769_v43 }
  0xbe   : > { %v567_v44 = vpop.permute.xlu1 %566 }
  0xbf   : > { %569 = vst.msk [vmem:[%s1801_s5 + $0x2] sm:$0x3] %vm335_vm8, %v567_v44 }
  0xc0   : > { %v333_v45 = vpop.permute.xlu0 %332 }
  0xc1   : > { %336 = vst.msk [vmem:[%s1801_s5] sm:$0x3] %vm335_vm8, %v333_v45 }
  0xc2   : > { %v1028_v46 = vpop.permute.xlu1 %1027 }
  0xc3   : > { %1030 = vst.msk [vmem:[%s1801_s5 + $0x6] sm:$0x3] %vm335_vm8, %v1028_v46 }
  0xc4   : > { %v798_v47 = vpop.permute.xlu0 %797 }
  0xc5   : > { %800 = vst.msk [vmem:[%s1801_s5 + $0x4] sm:$0x3] %vm335_vm8, %v798_v47 }
  0xc6   : > { %v596_v48 = vpop.permute.xlu1 %595 }
  0xc7   : > { %598 = vst.msk [vmem:[%s1801_s5 + $0x2] sm:$0x3] %vm365_vm9, %v596_v48 }
  0xc8   : > { %v363_v49 = vpop.permute.xlu0 %362 }
  0xc9   : > { %366 = vst.msk [vmem:[%s1801_s5] sm:$0x3] %vm365_vm9, %v363_v49 }
  0xca   : > { %v1057_v50 = vpop.permute.xlu1 %1056 }
  0xcb   : > { %1059 = vst.msk [vmem:[%s1801_s5 + $0x6] sm:$0x3] %vm365_vm9, %v1057_v50 }
  0xcc   : > { %v827_v51 = vpop.permute.xlu0 %826 }
  0xcd   : > { %829 = vst.msk [vmem:[%s1801_s5 + $0x4] sm:$0x3] %vm365_vm9, %v827_v51 }
  0xce   : > { %v625_v52 = vpop.permute.xlu1 %624 }
  0xcf   : > { %627 = vst.msk [vmem:[%s1801_s5 + $0x2] sm:$0x3] %vm395_vm10, %v625_v52 }
  0xd0   : > { %v393_v53 = vpop.permute.xlu0 %392 }
  0xd1   : > { %396 = vst.msk [vmem:[%s1801_s5] sm:$0x3] %vm395_vm10, %v393_v53 }
  0xd2   : > { %v1086_v54 = vpop.permute.xlu1 %1085 }
  0xd3   : > { %1088 = vst.msk [vmem:[%s1801_s5 + $0x6] sm:$0x3] %vm395_vm10, %v1086_v54 }
  0xd4   : > { %v856_v55 = vpop.permute.xlu0 %855 }
  0xd5   : > { %858 = vst.msk [vmem:[%s1801_s5 + $0x4] sm:$0x3] %vm395_vm10, %v856_v55 }
  0xd6   : > { %v654_v56 = vpop.permute.xlu1 %653 }
  0xd7   : > { %656 = vst.msk [vmem:[%s1801_s5 + $0x2] sm:$0x3] %vm425_vm11, %v654_v56 }
  0xd8   : > { %v423_v57 = vpop.permute.xlu0 %422 }
  0xd9   : > { %426 = vst.msk [vmem:[%s1801_s5] sm:$0x3] %vm425_vm11, %v423_v57 }
  0xda   : > { %v1115_v58 = vpop.permute.xlu1 %1114 }
  0xdb   : > { %1117 = vst.msk [vmem:[%s1801_s5 + $0x6] sm:$0x3] %vm425_vm11, %v1115_v58 }
  0xdc   : > { %v885_v59 = vpop.permute.xlu0 %884 }
  0xdd   : > { %887 = vst.msk [vmem:[%s1801_s5 + $0x4] sm:$0x3] %vm425_vm11, %v885_v59 }
  0xde   : > { %1426 = shalt.err (!%p1423_p8)
}
  0xdf   : > { %s1427_s16 = scalar_lea.hbm %s1853_s23, 128  ;;  %s1431_s22 = scalar_lea.hbm %s1897_s1, 256 }
  0xe0   : > { %p1428_p10 = scmp.ne.s32.totalorder %s1853_s23, %s1427_s16  ;;  %p1432_p1 = scmp.lt.s32.totalorder %s1853_s23, %s1897_s1 }
  0xe1   : > { %p1433_p2 = scmp.lt.s32.totalorder %s1431_s22, %s1427_s16 }
  0xe2   : > { %p1429_p13 = pnand %p1428_p10, %p1570_p9 }
  0xe3   : > { %p1434_p3 = por %p1433_p2, %p1432_p1 }
  0xe4   : > { %p1430_p0 = pneg %p1429_p13 }
  0xe6   : > { %p1435_p4 = pnand %p1434_p3, %p1430_p0 }
  0xe8   : > { %1438 = shalt.err (!%p1435_p4)
}
  0xe9   : > { %1345 = dma.vmem_to_hbm [thread:$0]  (%p1570_p9), %s1136_s13, 128, %s1853_s23, %s1119_s24  }
  0xea PF: > { %s1147_s2 = sand.u32 1, %s1473_s6   ;;  %p1348_p5 = pnand %p1222_p12, %p1577_p11 }
  0xeb   : > { %s1148_s3 = scalar_lea.sflag [#allocation4], %s1147_s2 }
  0xec   : > { %p1349_p6 = pneg %p1348_p5 }
  0xee   : > { %1468 = dma.done.wait (%p1349_p6), %s1148_s3, 128  }
  0xef   : > { %1470 = vsyncadd (%p1349_p6), %s1148_s3, 4294967168  ;;  %s17_s11 = sadd.s32 1, %s1493_s11   ;;  %s1902_s6 = smov %s1477_s7 }
  0xf0   : > { %p14_p7 = scmp.ge.s32.totalorder %s17_s11, 4   ;;  %s1903_s7 = smov %s1481_s8 }
  0xf1   : > { %s1904_s8 = smov %s1575_s20  ;;  %s1905_s9 = smov %s1489_s10 }
  0xf2   : > { %s1906_s10 = smov %s1908_s14  ;;  %16 = sbr.rel (!%p14_p7) target bundleno = 6 (0x6), region = 75 }
  0xf7   :  { %1153 = vsyncpa [#allocation3], 1 }
  0xf8   :  { %1155 = vsyncpa [#allocation3 + $0x1], 1 }
  0xf9   :  { %1156 = vsyncpa [#allocation4], 1 }
  0xfa   :  { %1158 = vsyncpa [#allocation4 + $0x1], 1 }

</bundles_post_ra>
